<compile_context>
chip_gen: v7x
topology: tpu7x:2x2x1
jax: 0.10.0
libtpu: 0.0.40
codegen_flags: <defaults>
</compile_context>

<pallas_src>
import math

import jax
import jax.numpy as jnp
from jax import lax
from jax.experimental import pallas as pl
from jax.experimental.pallas import tpu as pltpu


# ---------------------------------------------------------------------------
# Shared 2-layer MLP applied to a VMEM-resident activation block.
#   x  : (N, D) f32     w1 : (H, D) f32 (lane-dense, pre-upcast from bf16)
#   b1 : (1, H) f32     w2 : (H, E) f32     b2 : (1, E) f32
# ---------------------------------------------------------------------------
def _mlp(x, w1, b1, w2, b2):
    # First linear: contract the last dims of x (N, D) and w1 (H, D) -> (N, H).
    h = lax.dot_general(
        x, w1, (((1,), (1,)), ((), ())), preferred_element_type=jnp.float32
    ) + b1
    h = jnp.maximum(h, 0.0)  # ReLU on the f32 accumulator
    return jnp.dot(h, w2, preferred_element_type=jnp.float32) + b2


# ---------------------------------------------------------------------------
# Fused Siamese kernel: both inputs share the weights resident in VMEM.
# ---------------------------------------------------------------------------
def _siamese_kernel(x1_ref, x2_ref, w1_ref, b1_ref, w2_ref, b2_ref, o1_ref, o2_ref):
    w1 = w1_ref[...].astype(jnp.float32)  # bf16 -> f32 once, in VMEM
    w2 = w2_ref[...].astype(jnp.float32)
    b1 = b1_ref[...]
    b2 = b2_ref[...]
    o1_ref[...] = _mlp(x1_ref[...], w1, b1, w2, b2).astype(o1_ref.dtype)
    o2_ref[...] = _mlp(x2_ref[...], w1, b1, w2, b2).astype(o2_ref.dtype)


# Single-input variant for GNNet.get_embedding.
def _embed_kernel(x_ref, w1_ref, b1_ref, w2_ref, b2_ref, o_ref):
    w1 = w1_ref[...].astype(jnp.float32)
    w2 = w2_ref[...].astype(jnp.float32)
    o_ref[...] = _mlp(x_ref[...], w1, b1_ref[...], w2, b2_ref[...]).astype(o_ref.dtype)


def _cost(rows, D, H, E):
    flops = 2 * rows * (D * H + H * E)
    bytes_accessed = (
        4 * rows * D            # activations in (f32)
        + 2 * (H * D + H * E)   # bf16 weights
        + 4 * (H + E)           # f32 biases
        + 4 * rows * E          # outputs (f32)
    )
    return pl.CostEstimate(flops=flops, transcendentals=0, bytes_accessed=bytes_accessed)


def _siamese_pallas(x1, x2, w1, b1, w2, b2):
    """One pallas_call, two inputs, two outputs; weights DMA'd once."""
    n1, D = x1.shape
    n2, _ = x2.shape
    H, _ = w1.shape   # w1 is (H, D), lane-dense
    E = w2.shape[1]

    return pl.pallas_call(
        _siamese_kernel,
        out_shape=(
            jax.ShapeDtypeStruct((n1, E), jnp.float32),
            jax.ShapeDtypeStruct((n2, E), jnp.float32),
        ),
        grid=(1,),
        in_specs=[
            pl.BlockSpec((n1, D), lambda i: (0, 0)),
            pl.BlockSpec((n2, D), lambda i: (0, 0)),
            pl.BlockSpec((H, D), lambda i: (0, 0)),
            pl.BlockSpec((1, H), lambda i: (0, 0)),
            pl.BlockSpec((H, E), lambda i: (0, 0)),
            pl.BlockSpec((1, E), lambda i: (0, 0)),
        ],
        out_specs=(
            pl.BlockSpec((n1, E), lambda i: (0, 0)),
            pl.BlockSpec((n2, E), lambda i: (0, 0)),
        ),
        compiler_params=pltpu.CompilerParams(dimension_semantics=("arbitrary",)),
        cost_estimate=_cost(n1 + n2, D, H, E),
    )(x1, x2, w1, b1, w2, b2)


def _embed_pallas(x, w1, b1, w2, b2):
    n, D = x.shape
    H, _ = w1.shape
    E = w2.shape[1]
    return pl.pallas_call(
        _embed_kernel,
        out_shape=jax.ShapeDtypeStruct((n, E), jnp.float32),
        grid=(1,),
        in_specs=[
            pl.BlockSpec((n, D), lambda i: (0, 0)),
            pl.BlockSpec((H, D), lambda i: (0, 0)),
            pl.BlockSpec((1, H), lambda i: (0, 0)),
            pl.BlockSpec((H, E), lambda i: (0, 0)),
            pl.BlockSpec((1, E), lambda i: (0, 0)),
        ],
        out_specs=pl.BlockSpec((n, E), lambda i: (0, 0)),
        compiler_params=pltpu.CompilerParams(dimension_semantics=("arbitrary",)),
        cost_estimate=_cost(n, D, H, E),
    )(x, w1, b1, w2, b2)


# ---------------------------------------------------------------------------
# GNNet forward: Siamese application of the SAME (shared) embedding weights.
# ---------------------------------------------------------------------------
def _flatten_f32(x):
    # Metadata-only reshape in HBM; cast only if needed (no-op for f32 inputs).
    xf = x.reshape(x.shape[0], -1)
    return xf if xf.dtype == jnp.float32 else xf.astype(jnp.float32)


def gnnet_forward(input1, input2, params):
    w1, b1, w2, b2 = params
    return _siamese_pallas(_flatten_f32(input1), _flatten_f32(input2), w1, b1, w2, b2)


def get_embedding(x, params):
    w1, b1, w2, b2 = params
    return _embed_pallas(_flatten_f32(x), w1, b1, w2, b2)


# ---------------------------------------------------------------------------
# Deterministic parameter init (mimics PyTorch nn.Linear default init).
# Weights stored bf16 (halves HBM traffic); biases kept f32 (tiny, added to f32 acc).
# w1 is stored transposed as (H, D) so the largest operand is lane-dense in VMEM.
# ---------------------------------------------------------------------------
def init_params(key, d_in, d_hidden, d_emb):
    k1, k2, k3, k4 = jax.random.split(key, 4)
    bound1 = 1.0 / math.sqrt(d_in)
    bound2 = 1.0 / math.sqrt(d_hidden)
    w1 = jax.random.uniform(k1, (d_hidden, d_in), jnp.float32, -bound1, bound1)
    b1 = jax.random.uniform(k2, (1, d_hidden), jnp.float32, -bound1, bound1)
    w2 = jax.random.uniform(k3, (d_hidden, d_emb), jnp.float32, -bound2, bound2)
    b2 = jax.random.uniform(k4, (1, d_emb), jnp.float32, -bound2, bound2)
    return w1.astype(jnp.bfloat16), b1, w2.astype(jnp.bfloat16), b2


if __name__ == "__main__":
    # Small shapes consistent with a Siamese image-embedding forward:
    # batch=2, channels=4, spatial=16x16  ->  flattened D = 4*16*16 = 1024
    N, C, Himg, Wimg = 2, 4, 16, 16
    D = C * Himg * Wimg
    HID, EMB = 32, 16

    key = jax.random.PRNGKey(0)
    k_x1, k_x2, k_p = jax.random.split(key, 3)

    input1 = jax.random.normal(k_x1, (N, C, Himg, Wimg), jnp.float32)
    input2 = jax.random.normal(k_x2, (N, C, Himg, Wimg), jnp.float32)
    params = init_params(k_p, D, HID, EMB)

    out1, out2 = gnnet_forward(input1, input2, params)
    jax.block_until_ready(out1)
    jax.block_until_ready(out2)

    # Reference: plain-JAX forward of the same embedding net (same bf16 weight values,
    # f32 math). Tolerance accounts for MXU matmul-pass precision differences.
    w1f = params[0].astype(jnp.float32)  # (H, D)
    w2f = params[2].astype(jnp.float32)  # (H, E)

    def ref_embed(x):
        xf = x.reshape(x.shape[0], -1).astype(jnp.float32)
        h = jnp.maximum(xf @ w1f.T + params[1], 0.0)
        return h @ w2f + params[3]

    r1, r2 = ref_embed(input1), ref_embed(input2)
    assert out1.shape == (N, EMB) and out2.shape == (N, EMB)
    assert jnp.allclose(out1, r1, atol=1e-2, rtol=1e-2)
    assert jnp.allclose(out2, r2, atol=1e-2, rtol=1e-2)

    # get_embedding path (single-input API of GNNet)
    e1 = get_embedding(input1, params)
    jax.block_until_ready(e1)
    assert jnp.allclose(e1, r1, atol=1e-2, rtol=1e-2)

    print("KERNEL_OK")
</pallas_src>

<mosaic_0001>
module attributes {stable_mosaic.version = 11 : i64} {
  func.func @_siamese_kernel(%arg0: i32, %arg1: memref<2x1024xf32, #tpu.memory_space<vmem>>, %arg2: memref<2x1024xf32, #tpu.memory_space<vmem>>, %arg3: memref<32x1024xbf16, #tpu.memory_space<vmem>>, %arg4: memref<1x32xf32, #tpu.memory_space<vmem>>, %arg5: memref<32x16xbf16, #tpu.memory_space<vmem>>, %arg6: memref<1x16xf32, #tpu.memory_space<vmem>>, %arg7: memref<2x16xf32, #tpu.memory_space<vmem>>, %arg8: memref<2x16xf32, #tpu.memory_space<vmem>>) attributes {dimension_semantics = [#tpu.dimension_semantics<arbitrary>], iteration_bounds = array<i64: 1>, scalar_prefetch = 0 : i64, scratch_operands = 0 : i64, tpu.core_type = #tpu.core_type<tc>, window_params = [{pipeline_mode = #tpu.pipeline_mode<synchronous>, transform_indices = @transform_0, window_bounds = array<i64: 2, 1024>}, {pipeline_mode = #tpu.pipeline_mode<synchronous>, transform_indices = @transform_1, window_bounds = array<i64: 2, 1024>}, {pipeline_mode = #tpu.pipeline_mode<synchronous>, transform_indices = @transform_2, window_bounds = array<i64: 32, 1024>}, {pipeline_mode = #tpu.pipeline_mode<synchronous>, transform_indices = @transform_3, window_bounds = array<i64: 1, 32>}, {pipeline_mode = #tpu.pipeline_mode<synchronous>, transform_indices = @transform_4, window_bounds = array<i64: 32, 16>}, {pipeline_mode = #tpu.pipeline_mode<synchronous>, transform_indices = @transform_5, window_bounds = array<i64: 1, 16>}, {pipeline_mode = #tpu.pipeline_mode<synchronous>, transform_indices = @transform_6, window_bounds = array<i64: 2, 16>}, {pipeline_mode = #tpu.pipeline_mode<synchronous>, transform_indices = @transform_7, window_bounds = array<i64: 2, 16>}]} {
    %c0 = arith.constant 0 : index
    %c0_0 = arith.constant 0 : index
    %0 = vector.load %arg3[%c0, %c0_0] : memref<32x1024xbf16, #tpu.memory_space<vmem>>, vector<32x1024xbf16>
    %1 = arith.extf %0 : vector<32x1024xbf16> to vector<32x1024xf32>
    %c0_1 = arith.constant 0 : index
    %c0_2 = arith.constant 0 : index
    %2 = vector.load %arg5[%c0_1, %c0_2] : memref<32x16xbf16, #tpu.memory_space<vmem>>, vector<32x16xbf16>
    %3 = arith.extf %2 : vector<32x16xbf16> to vector<32x16xf32>
    %c0_3 = arith.constant 0 : index
    %c0_4 = arith.constant 0 : index
    %4 = vector.load %arg4[%c0_3, %c0_4] : memref<1x32xf32, #tpu.memory_space<vmem>>, vector<1x32xf32>
    %c0_5 = arith.constant 0 : index
    %c0_6 = arith.constant 0 : index
    %5 = vector.load %arg6[%c0_5, %c0_6] : memref<1x16xf32, #tpu.memory_space<vmem>>, vector<1x16xf32>
    %c0_7 = arith.constant 0 : index
    %c0_8 = arith.constant 0 : index
    %6 = vector.load %arg1[%c0_7, %c0_8] : memref<2x1024xf32, #tpu.memory_space<vmem>>, vector<2x1024xf32>
    %cst = arith.constant dense<0.000000e+00> : vector<2x32xf32>
    %7 = tpu.matmul %6, %1, %cst {dimension_numbers = #tpu.dot_dimension_numbers<[1], [1], [0], [0], [0, 0, 1, 0], [], []>} : vector<2x1024xf32>, vector<32x1024xf32>, vector<2x32xf32> -> vector<2x32xf32>
    %8 = vector.broadcast %4 : vector<1x32xf32> to vector<2x32xf32>
    %9 = arith.addf %7, %8 : vector<2x32xf32>
    %cst_9 = arith.constant 0.000000e+00 : f32
    %10 = vector.broadcast %cst_9 : f32 to vector<2x32xf32>
    %11 = arith.maximumf %9, %10 : vector<2x32xf32>
    %cst_10 = arith.constant dense<0.000000e+00> : vector<2x16xf32>
    %12 = tpu.matmul %11, %3, %cst_10 {dimension_numbers = #tpu.dot_dimension_numbers<[1], [0], [0], [1], [0, 0, 1, 1], [], []>} : vector<2x32xf32>, vector<32x16xf32>, vector<2x16xf32> -> vector<2x16xf32>
    %13 = vector.broadcast %5 : vector<1x16xf32> to vector<2x16xf32>
    %14 = arith.addf %12, %13 : vector<2x16xf32>
    %c0_11 = arith.constant 0 : index
    %c0_12 = arith.constant 0 : index
    %15 = vector.load %arg7[%c0_11, %c0_12] : memref<2x16xf32, #tpu.memory_space<vmem>>, vector<2x16xf32>
    tpu.vector_store %arg7[%c0_11, %c0_12], %14 {strides = array<i32>} : memref<2x16xf32, #tpu.memory_space<vmem>>, vector<2x16xf32>,
    %c0_13 = arith.constant 0 : index
    %c0_14 = arith.constant 0 : index
    %16 = vector.load %arg2[%c0_13, %c0_14] : memref<2x1024xf32, #tpu.memory_space<vmem>>, vector<2x1024xf32>
    %cst_15 = arith.constant dense<0.000000e+00> : vector<2x32xf32>
    %17 = tpu.matmul %16, %1, %cst_15 {dimension_numbers = #tpu.dot_dimension_numbers<[1], [1], [0], [0], [0, 0, 1, 0], [], []>} : vector<2x1024xf32>, vector<32x1024xf32>, vector<2x32xf32> -> vector<2x32xf32>
    %18 = vector.broadcast %4 : vector<1x32xf32> to vector<2x32xf32>
    %19 = arith.addf %17, %18 : vector<2x32xf32>
    %cst_16 = arith.constant 0.000000e+00 : f32
    %20 = vector.broadcast %cst_16 : f32 to vector<2x32xf32>
    %21 = arith.maximumf %19, %20 : vector<2x32xf32>
    %cst_17 = arith.constant dense<0.000000e+00> : vector<2x16xf32>
    %22 = tpu.matmul %21, %3, %cst_17 {dimension_numbers = #tpu.dot_dimension_numbers<[1], [0], [0], [1], [0, 0, 1, 1], [], []>} : vector<2x32xf32>, vector<32x16xf32>, vector<2x16xf32> -> vector<2x16xf32>
    %23 = vector.broadcast %5 : vector<1x16xf32> to vector<2x16xf32>
    %24 = arith.addf %22, %23 : vector<2x16xf32>
    %c0_18 = arith.constant 0 : index
    %c0_19 = arith.constant 0 : index
    %25 = vector.load %arg8[%c0_18, %c0_19] : memref<2x16xf32, #tpu.memory_space<vmem>>, vector<2x16xf32>
    tpu.vector_store %arg8[%c0_18, %c0_19], %24 {strides = array<i32>} : memref<2x16xf32, #tpu.memory_space<vmem>>, vector<2x16xf32>,
    return
  }
  func.func @transform_0(%arg0: i32) -> (i32, i32) {
    %c0_i32 = arith.constant 0 : i32
    %c0_i32_0 = arith.constant 0 : i32
    %c0_i32_1 = arith.constant 0 : i32
    return %c0_i32, %c0_i32_0 : i32, i32
  }
  func.func @transform_1(%arg0: i32) -> (i32, i32) {
    %c0_i32 = arith.constant 0 : i32
    %c0_i32_0 = arith.constant 0 : i32
    %c0_i32_1 = arith.constant 0 : i32
    return %c0_i32, %c0_i32_0 : i32, i32
  }
  func.func @transform_2(%arg0: i32) -> (i32, i32) {
    %c0_i32 = arith.constant 0 : i32
    %c0_i32_0 = arith.constant 0 : i32
    %c0_i32_1 = arith.constant 0 : i32
    return %c0_i32, %c0_i32_0 : i32, i32
  }
  func.func @transform_3(%arg0: i32) -> (i32, i32) {
    %c0_i32 = arith.constant 0 : i32
    %c0_i32_0 = arith.constant 0 : i32
    %c0_i32_1 = arith.constant 0 : i32
    return %c0_i32, %c0_i32_0 : i32, i32
  }
  func.func @transform_4(%arg0: i32) -> (i32, i32) {
    %c0_i32 = arith.constant 0 : i32
    %c0_i32_0 = arith.constant 0 : i32
    %c0_i32_1 = arith.constant 0 : i32
    return %c0_i32, %c0_i32_0 : i32, i32
  }
  func.func @transform_5(%arg0: i32) -> (i32, i32) {
    %c0_i32 = arith.constant 0 : i32
    %c0_i32_0 = arith.constant 0 : i32
    %c0_i32_1 = arith.constant 0 : i32
    return %c0_i32, %c0_i32_0 : i32, i32
  }
  func.func @transform_6(%arg0: i32) -> (i32, i32) {
    %c0_i32 = arith.constant 0 : i32
    %c0_i32_0 = arith.constant 0 : i32
    %c0_i32_1 = arith.constant 0 : i32
    return %c0_i32, %c0_i32_0 : i32, i32
  }
  func.func @transform_7(%arg0: i32) -> (i32, i32) {
    %c0_i32 = arith.constant 0 : i32
    %c0_i32_0 = arith.constant 0 : i32
    %c0_i32_1 = arith.constant 0 : i32
    return %c0_i32, %c0_i32_0 : i32, i32
  }
}

</mosaic_0001>

<bundles_post_ra>
// kernel: tpu_custom_call.1
= control target key start
LH: loop header
LB: loop body
LE: loop exit
PB: predicated region body
PF: predicated region fallthrough
CT: control target
= control target key end

     0   :  { %13 = vsyncpa [#allocation3], 0  ;;  %s1407_s0 = inlined_call_operand.vmem [shape: f32[2,1024], index: 0, kind: input, shape index: {}]   ;;  %s1408_s1 = inlined_call_operand.hbm [shape: f32[2,1024], index: 1, kind: input, shape index: {}]   ;;  %s1409_s2 = inlined_call_operand.hbm [shape: bf16[32,1024], index: 2, kind: input, shape index: {}]   ;;  %s1410_s3 = inlined_call_operand.vmem [shape: f32[1,32], index: 3, kind: input, shape index: {}]   ;;  %s1411_s4 = inlined_call_operand.vmem [shape: bf16[32,16], index: 4, kind: input, shape index: {}]   ;;  %s1412_s5 = inlined_call_operand.vmem [shape: f32[1,16], index: 5, kind: input, shape index: {}]   ;;  %s1413_s6 = inlined_call_operand.hbm [shape: f32[2,16], index: 6, kind: output, shape index: {0}]   ;;  %s1414_s7 = inlined_call_operand.hbm [shape: f32[2,16], index: 7, kind: output, shape index: {1}]  }
   0x1   :  { %14 = vsyncpa [#allocation6], 0 }
   0x2   :  { %15 = vsyncpa [#allocation4], 0 }
   0x3   :  { %16 = vsyncpa [#allocation9], 0  ;;  %s1234_s24 = smov [#allocation2]   ;;  %s1235_s26 = smov [#allocation5]  }
   0x4   :  { %s25_s25 = sshll.u32 %s1234_s24, 4  ;;  %s34_s27 = sshll.u32 %s1235_s26, 4  ;;  %s26_s25 = int_to_ptr.vmem [resolvable:$true] %s25_s25  ;;  %s1284_s27 = int_to_ptr.vmem [resolvable:$true] %s34_s27 }
   0x5   :  { %s1138_s30 = scalar_lea.hbm %s1408_s1, 256 }
   0x6   :  { %p1139_p0 = scmp.ne.s32.totalorder %s1408_s1, %s1138_s30  ;;  %p1142_p1 = scmp.lt.u32.totalorder %s1138_s30, %s1408_s1 }
   0x8   :  { %p1144_p2 = pnand %p1142_p1, %p1139_p0 }
   0xa   :  { %1147 = shalt.err (!%p1144_p2)
}
   0xb   :  { %s1148_s12 = scalar_lea.vmem %s26_s25, 256  ;;  %p1153_p4 = scmp.lt.s32.totalorder %s26_s25, %s26_s25 }
   0xc   :  { %p1149_p3 = scmp.ne.s32.totalorder %s26_s25, %s1148_s12  ;;  %p1154_p5 = scmp.lt.s32.totalorder %s1148_s12, %s1148_s12 }
   0xe   :  { %p1155_p6 = por %p1154_p5, %p1153_p4 }
  0x10   :  { %p1156_p7 = pnand %p1155_p6, %p1149_p3 }
  0x12   :  { %1159 = shalt.err (!%p1156_p7)
}
  0x13   :  { %28 = dma.hbm_to_vmem [thread:$0]  %s1408_s1, 256, %s26_s25, [#allocation3]  }
  0x14   :  { %s1160_s17 = scalar_lea.hbm %s1409_s2, 2048 }
  0x15   :  { %p1161_p8 = scmp.ne.s32.totalorder %s1409_s2, %s1160_s17  ;;  %p1164_p9 = scmp.lt.u32.totalorder %s1160_s17, %s1409_s2 }
  0x17   :  { %p1166_p10 = pnand %p1164_p9, %p1161_p8 }
  0x19   :  { %1169 = shalt.err (!%p1166_p10)
}
  0x1a   :  { %s1170_s22 = scalar_lea.vmem %s1284_s27, 2048  ;;  %p1175_p12 = scmp.lt.s32.totalorder %s1284_s27, %s1284_s27 }
  0x1b   :  { %p1171_p11 = scmp.ne.s32.totalorder %s1284_s27, %s1170_s22  ;;  %p1176_p13 = scmp.lt.s32.totalorder %s1170_s22, %s1170_s22 }
  0x1d   :  { %p1177_p0 = por %p1176_p13, %p1175_p12 }
  0x1f   :  { %p1178_p1 = pnand %p1177_p0, %p1171_p11 }
  0x21   :  { %1181 = shalt.err (!%p1178_p1)
}
  0x22   :  { %s1236_s1 = smov 512   ;;  %s1237_s23 = smov 32  }
  0x23   :  { %40 = dma.hbm_to_vmem [thread:$0]  %s1409_s2, 2048, %s1284_s27, [#allocation6], %s1236_s1, %s1236_s1, %s1237_s23  }
  0x24   :  { %1226 = dma.done.wait [#allocation3], 256  }
  0x25   :  { %1227 = vsyncadd [#allocation3], 4294967040 }
  0x26   :  { %1228 = dma.done.wait [#allocation6], 2048  }
  0x27   :  { %1229 = vsyncadd [#allocation6], 4294965248  ;;  %v125_v0 = vlaneseq  ;;  %v1238_v1 = vmov 1983009808   ;;  %v1239_v3 = vmov 0.0|0.0   ;;  %v53_v7 = vld [vmem:[#allocation5] sm:$0xff] }
  0x28   :  { %v123_v2 = vunpack.c.l.s4 %v1238_v1  ;;  %1034 = vmatprep.subr.bf16.mxu1 %v1239_v3  ;;  %v57_v8 = vld [vmem:[#allocation5 + $0x20] sm:$0xff]  ;;  %v111_v13 = vld [vmem:[%s1407_s0] sm:$0xff]  ;;  %v54_v17 = vld [vmem:[#allocation5 + $0x8] sm:$0xff]  ;;  %vm1240_vm0 = vmmov 0   ;;  %v1241_v53 = vmov 0.0   ;;  %vm450_vm1 = vcmask 261120  }
  0x29   :  { %v126_v4 = vshrl.u32 %v125_v0, 7  ;;  %v61_v9 = vld [vmem:[#allocation5 + $0x40] sm:$0xff]  ;;  %v1092_v10 = vcombine.high %v53_v7, %v57_v8  ;;  %v1318_v11 = vcombine.low %v53_v7, %v57_v8  ;;  %v58_v18 = vld [vmem:[#allocation5 + $0x28] sm:$0xff]  ;;  %v962_v19 = vld [vmem:[%s1411_s4] sm:$0xff]   ;;  %v121_v21 = vcombine.high %v111_v13, %v111_v13  ;;  %988 = vmatprep.mubr.msk.f32.mxu1 %vm1240_vm0, %v1241_v53  ;;  %s1242_s11 = smov [#allocation7]  }
  0x2a   :  { %v124_v5 = vunpack.c.0.s8 %v123_v2  ;;  %v65_v12 = vld [vmem:[#allocation5 + $0x60] sm:$0xff]  ;;  %1036 = vmatpush3.bf16.msra.mxu1 %v962_v19  ;;  %v969_v22 = vld [vmem:[%s1411_s4 + $0x8] sm:$0xff]   ;;  %v1337_v23 = vcombine.high %v54_v17, %v58_v18  ;;  %v62_v25 = vld [vmem:[#allocation5 + $0x48] sm:$0xff]  ;;  %v1342_v27 = vcombine.low %v54_v17, %v58_v18  ;;  %vm524_vm2 = vcmask 123904   ;;  %s933_s12 = sshll.u32 %s1242_s11, 4  ;;  %s934_s12 = int_to_ptr.vmem [resolvable:$true] %s933_s12 }
  0x2b   :  { %v1323_v14 = vcombine.high %v61_v9, %v65_v12  ;;  %1003 = vmatprep.subr.bf16.mxu0 %v1092_v10  ;;  %v1331_v20 = vcombine.low %v61_v9, %v65_v12  ;;  %1037 = vmatprep.subr.bf16.mxu1 %v1239_v3  ;;  %v66_v26 = vld [vmem:[#allocation5 + $0x68] sm:$0xff]  ;;  %v55_v30 = vld [vmem:[#allocation5 + $0x10] sm:$0xff]  ;;  %v112_v34 = vld [vmem:[%s1407_s0 + $0x8] sm:$0xff]  ;;  %s1182_s13 = scalar_lea.vmem %s934_s12, 32  ;;  %p1187_p3 = scmp.lt.s32.totalorder %s934_s12, %s934_s12 }
  0x2c   :  { %v1316_v6 = vsub.s32 %v124_v5, %v126_v4  ;;  %1005 = vmatpush1.bf16.xpose.msra.mxu0 %v1318_v11  ;;  %v1344_v29 = vcombine.high %v62_v25, %v66_v26  ;;  %v59_v31 = vld [vmem:[#allocation5 + $0x30] sm:$0xff]  ;;  %v1348_v32 = vcombine.low %v62_v25, %v66_v26  ;;  %v56_v41 = vld [vmem:[#allocation5 + $0x18] sm:$0xff]  ;;  %v138_v44 = vcombine.high %v112_v34, %v112_v34  ;;  %p1183_p2 = scmp.ne.s32.totalorder %s934_s12, %s1182_s13  ;;  %p1188_p4 = scmp.lt.s32.totalorder %s1182_s13, %s1182_s13 }
  0x2d   :  { %1007 = vmatprep.subr.bf16.mxu0 %v1323_v14  ;;  %v1350_v33 = vcombine.high %v55_v30, %v59_v31  ;;  %v63_v36 = vld [vmem:[#allocation5 + $0x50] sm:$0xff]  ;;  %v1101_v38 = vcombine.low %v55_v30, %v59_v31  ;;  %v60_v42 = vld [vmem:[#allocation5 + $0x38] sm:$0xff] }
  0x2e   :  { %v128_v15 = vrot.slane %v111_v13, %v1316_v6  ;;  %1039 = vmatpush3.bf16.msra.mxu1 %v969_v22  ;;  %v135_v24 = vrot.slane %v121_v21, %v1316_v6  ;;  %v145_v35 = vrot.slane %v112_v34, %v1316_v6  ;;  %v67_v37 = vld [vmem:[#allocation5 + $0x70] sm:$0xff]  ;;  %v1104_v45 = vcombine.high %v56_v41, %v60_v42  ;;  %v64_v47 = vld [vmem:[#allocation5 + $0x58] sm:$0xff]  ;;  %p1189_p5 = por %p1188_p4, %p1187_p3 }
  0x2f   :  { %1041 = vmatprep.subr.bf16.mxu1 %v1092_v10  ;;  %v1102_v40 = vcombine.high %v63_v36, %v67_v37  ;;  %v1103_v43 = vcombine.low %v63_v36, %v67_v37  ;;  %v152_v46 = vrot.slane %v138_v44, %v1316_v6  ;;  %v68_v48 = vld [vmem:[#allocation5 + $0x78] sm:$0xff]  ;;  %v1105_v49 = vcombine.low %v56_v41, %v60_v42  ;;  %v526_v54 = vld [vmem:[#allocation2] sm:$0xff] }
  0x30   :  { %v136_v16 = vcombine.high %v128_v15, %v128_v15  ;;  %v137_v28 = vcombine.high %v135_v24, %v135_v24  ;;  %v153_v39 = vcombine.high %v145_v35, %v145_v35  ;;  %v1106_v51 = vcombine.high %v64_v47, %v68_v48  ;;  %v957_v55 = vld [vmem:[%s1410_s3] ss:$0 sm:$0xff]  ;;  %v527_v1 = vld [vmem:[#allocation2 + $0x8] sm:$0xff]  ;;  %p1190_p6 = pnand %p1189_p5, %p1183_p2 }
  0x31   :  { %v154_v50 = vcombine.high %v152_v46, %v152_v46  ;;  %v1107_v52 = vcombine.low %v64_v47, %v68_v48  ;;  %v537_v56 = vrot.slane %v526_v54, %v1316_v6  ;;  %v530_v62 = vcombine.high %v526_v54, %v526_v54  ;;  %v958_v8 = vld [vmem:[%s1412_s5] ss:$0 sm:$0xff] }
  0x32   :  { %227 = vmatprep.mubr.f32.mxu0 %v136_v16  ;;  %v554_v2 = vrot.slane %v527_v1, %v1316_v6  ;;  %v547_v4 = vcombine.high %v527_v1, %v527_v1 }
  0x33   :  { %v545_v60 = vcombine.high %v537_v56, %v537_v56  ;;  %v544_v63 = vrot.slane %v530_v62, %v1316_v6 }
  0x34   :  { %1009 = vmatpush1.bf16.xpose.msra.mxu0 %v1331_v20  ;;  %v561_v5 = vrot.slane %v547_v4, %v1316_v6 }
  0x35   :  { %1011 = vmatprep.subr.bf16.mxu0 %v1337_v23  ;;  %v546_v0 = vcombine.high %v544_v63, %v544_v63 }
  0x36   :  { %v563_v7 = vcombine.high %v561_v5, %v561_v5 }
  0x3b   :  { %228 = vmatmul.mubr.f32.vlgmr.msra.gmra.mrb[0].mxu0 %v128_v15 }
  0x3c   :  { %1013 = vmatpush1.bf16.xpose.msra.mxu0 %v1342_v27  ;;  %297 = vmatprep.mubr.f32.mxu0 %v137_v28 }
  0x3d   :  { %1015 = vmatprep.subr.bf16.mxu0 %v1344_v29 }
  0x44   :  { %1017 = vmatpush1.bf16.xpose.msra.mxu0 %v1348_v32 }
  0x45   :  { %1019 = vmatprep.subr.bf16.mxu0 %v1350_v33 }
  0x4b   :  { %298 = vmatmul.mubr.f32.vlgmr.msra.gmra.mrb[0].mxu0 %v135_v24 }
  0x4c   :  { %1021 = vmatpush1.bf16.xpose.msra.mxu0 %v1101_v38  ;;  %367 = vmatprep.mubr.f32.mxu0 %v153_v39 }
  0x4d   :  { %1023 = vmatprep.subr.bf16.mxu0 %v1102_v40 }
  0x54   :  { %1025 = vmatpush1.bf16.xpose.msra.mxu0 %v1103_v43 }
  0x55   :  { %1027 = vmatprep.subr.bf16.mxu0 %v1104_v45 }
  0x5b   :  { %368 = vmatmul.mubr.f32.vlgmr.msra.gmra.mrb[0].mxu0 %v145_v35 }
  0x5c   :  { %1029 = vmatpush1.bf16.xpose.msra.mxu0 %v1105_v49  ;;  %437 = vmatprep.mubr.f32.mxu0 %v154_v50 }
  0x5d   :  { %1031 = vmatprep.subr.bf16.mxu0 %v1106_v51 }
  0x64   :  { %1033 = vmatpush1.bf16.xpose.msra.mxu0 %v1107_v52 }
  0x65   :  { %1072 = vmatprep.subr.bf16.mxu0 %v1239_v3 }
  0x6b   :  { %438 = vmatmul.mubr.f32.vlgmr.msra.gmra.mrb[0].mxu0 %v152_v46 }
  0x6c   :  { %1074 = vmatpush3.bf16.msra.mxu0 %v962_v19  ;;  %999 = vmatprep.mubr.msk.f32.mxu0 %vm1240_vm0, %v1241_v53 }
  0x6d   :  { %1075 = vmatprep.subr.bf16.mxu0 %v1239_v3  ;;  %v562_v3 = vcombine.high %v554_v2, %v554_v2 }
  0x70   :  { %1077 = vmatpush3.bf16.msra.mxu0 %v969_v22 }
 0x13e   :  { %v439_v57 = vpop.f32.mrb[0].mxu0 }
 0x13f   :  { %v1078_v58 = vadd.f32 %v957_v55, %v439_v57  ;;  %v441_v59 = vpop.f32.mrb[1].mxu0 }
 0x141   :  { %v443_v61 = vmax.f32 %v1078_v58, 0.0 }
 0x143   :  { %989 = vmatmul.mubr.msk.f32.vlgmr.msra.gmra.mrb[0].mxu1 %vm450_vm1, %v443_v61 }
 0x144   :  { %1043 = vmatpush1.bf16.xpose.msra.mxu1 %v1318_v11  ;;  %636 = vmatprep.mubr.f32.mxu1 %v545_v60 }
 0x145   :  { %1045 = vmatprep.subr.bf16.mxu1 %v1323_v14 }
 0x14c   :  { %1047 = vmatpush1.bf16.xpose.msra.mxu1 %v1331_v20 }
 0x14d   :  { %1049 = vmatprep.subr.bf16.mxu1 %v1337_v23 }
 0x153   :  { %637 = vmatmul.mubr.f32.vlgmr.msra.gmra.mrb[2].mxu1 %v537_v56 }
 0x154   :  { %1051 = vmatpush1.bf16.xpose.msra.mxu1 %v1342_v27  ;;  %706 = vmatprep.mubr.f32.mxu1 %v546_v0 }
 0x155   :  { %1053 = vmatprep.subr.bf16.mxu1 %v1344_v29 }
 0x15c   :  { %1055 = vmatpush1.bf16.xpose.msra.mxu1 %v1348_v32 }
 0x15d   :  { %1057 = vmatprep.subr.bf16.mxu1 %v1350_v33 }
 0x163   :  { %707 = vmatmul.mubr.f32.vlgmr.msra.gmra.mrb[2].mxu1 %v544_v63 }
 0x164   :  { %1059 = vmatpush1.bf16.xpose.msra.mxu1 %v1101_v38  ;;  %776 = vmatprep.mubr.f32.mxu1 %v562_v3 }
 0x165   :  { %1061 = vmatprep.subr.bf16.mxu1 %v1102_v40 }
 0x16c   :  { %1063 = vmatpush1.bf16.xpose.msra.mxu1 %v1103_v43 }
 0x16d   :  { %1065 = vmatprep.subr.bf16.mxu1 %v1104_v45 }
 0x173   :  { %777 = vmatmul.mubr.f32.vlgmr.msra.gmra.mrb[2].mxu1 %v554_v2 }
 0x174   :  { %1067 = vmatpush1.bf16.xpose.msra.mxu1 %v1105_v49  ;;  %846 = vmatprep.mubr.f32.mxu1 %v563_v7 }
 0x175   :  { %1069 = vmatprep.subr.bf16.mxu1 %v1106_v51 }
 0x17c   :  { %1071 = vmatpush1.bf16.xpose.msra.mxu1 %v1107_v52 }
 0x183   :  { %847 = vmatmul.mubr.f32.vlgmr.msra.gmra.mrb[2].mxu1 %v561_v5 }
 0x216   :  { %v520_v9 = vpop.f32.mrb[0].mxu1 }
 0x217   :  { %v521_v10 = vadd.f32 %v958_v8, %v520_v9  ;;  %v990_v11 = vpop.f32.mrb[1].mxu1 }
 0x219   :  { %525 = vst.msk [vmem:[#allocation7] sm:$0x3] %vm524_vm2, %v521_v10 }
 0x256   :  { %v848_v12 = vpop.f32.mrb[2].mxu1 }
 0x257   :  { %v1079_v6 = vadd.f32 %v957_v55, %v848_v12  ;;  %v850_v13 = vpop.f32.mrb[3].mxu1 }
 0x259   :  { %v852_v14 = vmax.f32 %v1079_v6, 0.0 }
 0x25b   :  { %1000 = vmatmul.mubr.msk.f32.vlgmr.msra.gmra.mrb[2].mxu0 %vm450_vm1, %v852_v14 }
 0x25c   :  { %1193 = shalt.err (!%p1190_p6)
}
 0x25d   :  { %s1194_s15 = scalar_lea.hbm %s1413_s6, 32 }
 0x25e   :  { %p1195_p7 = scmp.ne.s32.totalorder %s1413_s6, %s1194_s15  ;;  %p1198_p8 = scmp.lt.u32.totalorder %s1194_s15, %s1413_s6 }
 0x260   :  { %p1200_p9 = pnand %p1198_p8, %p1195_p7 }
 0x262   :  { %1203 = shalt.err (!%p1200_p9)
}
 0x263   :  { %936 = dma.vmem_to_hbm [thread:$0]  %s934_s12, 32, %s1413_s6, [#allocation4]  }
 0x264   :  { %s1243_s22 = smov [#allocation8]  }
 0x265   :  { %s943_s1 = sshll.u32 %s1243_s22, 4  ;;  %s944_s1 = int_to_ptr.vmem [resolvable:$true] %s943_s1 }
 0x266   :  { %s1204_s23 = scalar_lea.vmem %s944_s1, 32  ;;  %p1209_p11 = scmp.lt.s32.totalorder %s944_s1, %s944_s1 }
 0x267   :  { %p1205_p10 = scmp.ne.s32.totalorder %s944_s1, %s1204_s23  ;;  %p1210_p12 = scmp.lt.s32.totalorder %s1204_s23, %s1204_s23 }
 0x269   :  { %p1211_p13 = por %p1210_p12, %p1209_p11 }
 0x26b   :  { %p1212_p0 = pnand %p1211_p13, %p1205_p10 }
 0x32e   :  { %v922_v15 = vpop.f32.mrb[2].mxu0 }
 0x32f   :  { %v923_v16 = vadd.f32 %v958_v8, %v922_v15  ;;  %v1001_v17 = vpop.f32.mrb[3].mxu0 }
 0x331   :  { %926 = vst.msk [vmem:[#allocation8] sm:$0x3] %vm524_vm2, %v923_v16 }
 0x332   :  { %1215 = shalt.err (!%p1212_p0)
}
 0x333   :  { %s1216_s2 = scalar_lea.hbm %s1414_s7, 32 }
 0x334   :  { %p1217_p1 = scmp.ne.s32.totalorder %s1414_s7, %s1216_s2  ;;  %p1220_p2 = scmp.lt.u32.totalorder %s1216_s2, %s1414_s7 }
 0x336   :  { %p1222_p3 = pnand %p1220_p2, %p1217_p1 }
 0x338   :  { %1225 = shalt.err (!%p1222_p3)
}
 0x339   :  { %946 = dma.vmem_to_hbm [thread:$0]  %s944_s1, 32, %s1414_s7, [#allocation9]  }
 0x33a   :  { %1230 = dma.done.wait [#allocation4], 32  }
 0x33b   :  { %1231 = vsyncadd [#allocation4], 4294967264 }
 0x33c   :  { %1232 = dma.done.wait [#allocation9], 32  }
 0x33d   :  { %1233 = vsyncadd [#allocation9], 4294967264 }
 0x33e   :  { %953 = vsyncpa [#allocation3], 1 }
 0x33f   :  { %954 = vsyncpa [#allocation6], 1 }
 0x340   :  { %955 = vsyncpa [#allocation4], 1 }
 0x341   :  { %956 = vsyncpa [#allocation9], 1 }

</bundles_post_ra>
